<compile_context>
chip_gen: v6e
topology: v6e:2x2x1
jax: 0.10.0
libtpu: 0.0.40
codegen_flags: <defaults>
</compile_context>

<pallas_src>
import functools
import math

import jax
import jax.numpy as jnp
from jax import lax
from jax.experimental import pallas as pl
from jax.experimental.pallas import tpu as pltpu


def _round_up(x, m):
    return (x + m - 1) // m * m


def _label_smoothing_kernel(x_ref, tgt_ref, acc_ref, *,
                            confidence, smooth_val, padding_idx,
                            tile_n, tile_v, acc_w, pad_block, pad_local,
                            unroll):
    j = pl.program_id(1)

    # Zero this row-tile's accumulator at the start of its column sweep.
    @pl.when(j == 0)
    def _():
        acc_ref[...] = jnp.zeros_like(acc_ref)

    col_base = j * tile_v
    local_col = lax.broadcasted_iota(jnp.int32, (8, tile_v), 1)
    conf_f = jnp.float32(confidence)
    smooth_f = jnp.float32(smooth_val)

    # Main loop: 8-row chunks, bounded vreg live set, carry = -sum w*x.
    def chunk(c, carry):
        r0 = pl.multiple_of(c * 8, 8)
        x_c = x_ref[pl.ds(r0, 8), :].astype(jnp.float32)     # (8, tile_v)
        tgt_c = tgt_ref[pl.ds(r0, 8), :]                      # (8, 1) int32
        rv = (tgt_c != padding_idx).astype(jnp.float32)       # row valid
        sel = local_col == (tgt_c - col_base)                 # target column?
        w = jnp.where(sel, conf_f, smooth_f)
        return carry - (w * x_c) * rv

    carry = lax.fori_loop(0, tile_n // 8, chunk,
                          jnp.zeros((8, tile_v), jnp.float32),
                          unroll=unroll)

    # Lane fold (8, tile_v) -> (8, acc_w): aligned 128-lane slices, pure vreg adds.
    folded = carry[:, 0:acc_w]
    for b in range(1, tile_v // acc_w):
        folded = folded + carry[:, b * acc_w:(b + 1) * acc_w]
    acc_ref[...] = acc_ref[...] + folded[None]

    # Padding-column correction, only on the column tile containing padding_idx:
    # the main loop charged -smooth_val*x[r, padding_idx] on valid rows; add it back.
    @pl.when(j == pad_block)
    def _():
        x_pad = x_ref[:, pad_local:pad_local + 1].astype(jnp.float32)   # (tile_n, 1)
        rv_all = (tgt_ref[...] != padding_idx).astype(jnp.float32)
        corr = jnp.sum(smooth_f * x_pad * rv_all)
        sub = lax.broadcasted_iota(jnp.int32, (8, acc_w), 0)
        lan = lax.broadcasted_iota(jnp.int32, (8, acc_w), 1)
        delta = jnp.where((sub == 0) & (lan == 0), corr, jnp.float32(0.0))
        acc_ref[...] = acc_ref[...] + delta[None]


def label_smoothing_loss(x, target, *, size, padding_idx, smoothing,
                         block_bytes=8 * 1024 * 1024, max_tile_n=4096):
    """Pallas equivalent of LabelSmoothing(size, padding_idx, smoothing)(x, target)."""
    N, V = x.shape
    assert V == size, "x.shape[1] must equal `size`"

    confidence = 1.0 - smoothing
    smooth_val = smoothing / (size - 2)
    log_conf = math.log(confidence) if confidence > 0.0 else 0.0
    log_smooth = math.log(smooth_val) if smooth_val > 0.0 else 0.0
    # sum_c td*log(td) for one non-padding row (0*log0 := 0).
    row_const = confidence * log_conf + (size - 2) * smooth_val * log_smooth

    itemsize = int(jnp.dtype(x.dtype).itemsize)

    # ---- column tiling: lane-dense, tile_v <= 1024 so the carry stays in vregs ----
    if V % 128 == 0 or V <= 1024:
        V_work = V
    else:
        V_work = _round_up(V, 128)      # zero-padded columns contribute exactly 0
    if V_work % 128 == 0:
        tile_v = min(V_work, 1024)
        while V_work % tile_v:
            tile_v -= 128
    else:
        tile_v = V_work                 # small non-128-multiple vocab: full width
    acc_w = 128 if tile_v % 128 == 0 else tile_v

    # ---- row tiling: ~block_bytes blocks, multiple of 8, capped ----
    rows = max(8, block_bytes // (tile_v * itemsize))
    tile_n = max(8, min(max_tile_n, (rows // 8) * 8, _round_up(N, 8)))

    N_pad = _round_up(N, tile_n)
    target = target.astype(jnp.int32)
    x_k = x
    if V_work != V:
        x_k = jnp.pad(x_k, ((0, 0), (0, V_work - V)))
    if N_pad != N:
        # Padded rows carry target == padding_idx, so they contribute exactly 0.
        x_k = jnp.pad(x_k, ((0, N_pad - N), (0, 0)))
        target_k = jnp.pad(target, (0, N_pad - N), constant_values=padding_idx)
    else:
        target_k = target
    tgt2d = target_k.reshape(N_pad, 1)

    grid_rows = N_pad // tile_n
    grid_cols = V_work // tile_v
    pad_block = padding_idx // tile_v
    pad_local = padding_idx % tile_v

    n_chunks = tile_n // 8
    unroll = 4 if n_chunks % 4 == 0 else (2 if n_chunks % 2 == 0 else 1)

    kernel = functools.partial(
        _label_smoothing_kernel,
        confidence=confidence, smooth_val=smooth_val, padding_idx=padding_idx,
        tile_n=tile_n, tile_v=tile_v, acc_w=acc_w,
        pad_block=pad_block, pad_local=pad_local, unroll=unroll)

    # VMEM budget: double-buffered x blocks + lane-padded label blocks + slack.
    x_block_bytes = tile_n * tile_v * itemsize
    tgt_block_vmem = tile_n * 128 * 4
    vmem_limit = max(32 * 1024 * 1024,
                     min(56 * 1024 * 1024,
                         2 * x_block_bytes + 2 * tgt_block_vmem + 8 * 1024 * 1024))

    acc = pl.pallas_call(
        kernel,
        out_shape=jax.ShapeDtypeStruct((grid_rows, 8, acc_w), jnp.float32),
        grid_spec=pltpu.PrefetchScalarGridSpec(
            num_scalar_prefetch=0,
            grid=(grid_rows, grid_cols),
            in_specs=[
                pl.BlockSpec((tile_n, tile_v), lambda i, j: (i, j)),   # x tile
                pl.BlockSpec((tile_n, 1), lambda i, j: (i, 0)),        # labels
            ],
            # Per-row-tile partial accumulators -> the i axis is truly parallel
            # (both v7x TensorCores get work); summed once in the wrapper.
            out_specs=pl.BlockSpec((1, 8, acc_w), lambda i, j: (i, 0, 0)),
        ),
        compiler_params=pltpu.CompilerParams(
            dimension_semantics=("parallel", "arbitrary"),
            vmem_limit_bytes=int(vmem_limit),
        ),
        cost_estimate=pl.CostEstimate(
            flops=6 * N_pad * V_work,
            transcendentals=0,
            bytes_accessed=N_pad * V_work * itemsize + N_pad * 4
                           + grid_rows * 8 * acc_w * 4,
        ),
    )(x_k, tgt2d)

    n_valid = jnp.sum((target != padding_idx).astype(jnp.float32))
    return jnp.sum(acc) + n_valid * jnp.float32(row_const)


def _reference_loss(x, target, *, size, padding_idx, smoothing):
    """Pure-JAX reference mirroring the PyTorch module."""
    N, V = x.shape
    confidence = 1.0 - smoothing
    smooth_val = smoothing / (size - 2)
    col = jnp.arange(V)[None, :]
    tgt = target.astype(jnp.int32)[:, None]
    td = jnp.where(col == tgt, confidence, smooth_val)
    td = jnp.where(col == padding_idx, 0.0, td)
    td = jnp.where(tgt == padding_idx, 0.0, td)
    safe = jnp.where(td > 0.0, td, 1.0)
    return jnp.sum(jnp.where(td > 0.0, td * (jnp.log(safe) - x), 0.0))


if __name__ == "__main__":
    SIZE = 32          # vocab / class dimension (x.size(1))
    N = 16             # number of tokens (rows)
    PADDING_IDX = 0
    SMOOTHING = 0.1

    key = jax.random.PRNGKey(0)
    kx, kt = jax.random.split(key)

    logits = jax.random.normal(kx, (N, SIZE), dtype=jnp.float32)
    x = jax.nn.log_softmax(logits, axis=-1)            # KLDivLoss expects log-probs
    target = jax.random.randint(kt, (N,), 0, SIZE, dtype=jnp.int32)
    target = target.at[3].set(PADDING_IDX)             # include a padding token

    loss = label_smoothing_loss(
        x, target, size=SIZE, padding_idx=PADDING_IDX, smoothing=SMOOTHING
    )
    loss = jax.block_until_ready(loss)

    ref = _reference_loss(
        x, target, size=SIZE, padding_idx=PADDING_IDX, smoothing=SMOOTHING
    )
    assert jnp.allclose(loss, ref, rtol=1e-4, atol=1e-4), (loss, ref)

    print("KERNEL_OK")
</pallas_src>

<mosaic_0001>
module attributes {stable_mosaic.version = 11 : i64} {
  func.func @_label_smoothing_kernel(%arg0: i32, %arg1: i32, %arg2: memref<16x32xf32, #tpu.memory_space<vmem>>, %arg3: memref<16x1xi32, #tpu.memory_space<vmem>>, %arg4: memref<1x8x32xf32, #tpu.memory_space<vmem>>) attributes {dimension_semantics = [#tpu.dimension_semantics<parallel>, #tpu.dimension_semantics<arbitrary>], iteration_bounds = array<i64: 1, 1>, scalar_prefetch = 0 : i64, scratch_operands = 0 : i64, tpu.core_type = #tpu.core_type<tc>, window_params = [{transform_indices = @transform_0, window_bounds = array<i64: 16, 32>}, {transform_indices = @transform_1, window_bounds = array<i64: 16, 1>}, {transform_indices = @transform_2, window_bounds = array<i64: 1, 8, 32>}]} {
    %c0_i32 = arith.constant 0 : i32
    %0 = arith.cmpi eq, %arg1, %c0_i32 : i32
    %1 = arith.extui %0 : i1 to i32
    %c0_i32_0 = arith.constant 0 : i32
    %2 = arith.cmpi ne, %1, %c0_i32_0 : i32
    scf.if %2 {
      %cst_19 = arith.constant 0.000000e+00 : f32
      %55 = vector.broadcast %cst_19 : f32 to vector<1x8x32xf32>
      %c0_20 = arith.constant 0 : index
      %c0_21 = arith.constant 0 : index
      %c0_22 = arith.constant 0 : index
      %56 = vector.load %arg4[%c0_20, %c0_21, %c0_22] : memref<1x8x32xf32, #tpu.memory_space<vmem>>, vector<1x8x32xf32>
      tpu.vector_store %arg4[%c0_20, %c0_21, %c0_22], %55 {strides = array<i32>} : memref<1x8x32xf32, #tpu.memory_space<vmem>>, vector<1x8x32xf32>,
    } else {
    }
    %c32_i32 = arith.constant 32 : i32
    %3 = arith.muli %arg1, %c32_i32 : i32
    %4 = tpu.iota {dimensions = array<i32: 1>} : vector<8x32xi32>
    %cst = arith.constant 0.000000e+00 : f32
    %5 = vector.broadcast %cst : f32 to vector<8x32xf32>
    %cst_1 = arith.constant 0.899999976 : f32
    %cst_2 = arith.constant 0.00333333341 : f32
    %c0_i32_3 = arith.constant 0 : i32
    %c8_i32 = arith.constant 8 : i32
    %6 = arith.muli %c0_i32_3, %c8_i32 : i32
    %7 = tpu.assume_multiple %6, 8 : i32
    %8 = arith.index_cast %7 : i32 to index
    %c0 = arith.constant 0 : index
    %9 = vector.load %arg2[%8, %c0] : memref<16x32xf32, #tpu.memory_space<vmem>>, vector<8x32xf32>
    %10 = arith.index_cast %7 : i32 to index
    %c0_4 = arith.constant 0 : index
    %11 = vector.load %arg3[%10, %c0_4] : memref<16x1xi32, #tpu.memory_space<vmem>>, vector<8x1xi32>
    %c0_i32_5 = arith.constant 0 : i32
    %12 = vector.broadcast %c0_i32_5 : i32 to vector<8x1xi32>
    %13 = arith.cmpi ne, %11, %12 : vector<8x1xi32>
    %14 = arith.extui %13 : vector<8x1xi1> to vector<8x1xi32>
    %15 = arith.sitofp %14 : vector<8x1xi32> to vector<8x1xf32>
    %16 = vector.broadcast %3 : i32 to vector<8x1xi32>
    %17 = arith.subi %11, %16 : vector<8x1xi32>
    %18 = vector.broadcast %17 : vector<8x1xi32> to vector<8x32xi32>
    %19 = arith.cmpi eq, %4, %18 : vector<8x32xi32>
    %20 = vector.broadcast %cst_1 : f32 to vector<8x32xf32>
    %21 = vector.broadcast %cst_2 : f32 to vector<8x32xf32>
    %22 = arith.select %19, %20, %21 : vector<8x32xi1>, vector<8x32xf32>
    %23 = arith.mulf %22, %9 : vector<8x32xf32>
    %24 = vector.broadcast %15 : vector<8x1xf32> to vector<8x32xf32>
    %25 = arith.mulf %23, %24 : vector<8x32xf32>
    %26 = arith.subf %5, %25 : vector<8x32xf32>
    %c1_i32 = arith.constant 1 : i32
    %c8_i32_6 = arith.constant 8 : i32
    %27 = arith.muli %c1_i32, %c8_i32_6 : i32
    %28 = tpu.assume_multiple %27, 8 : i32
    %29 = arith.index_cast %28 : i32 to index
    %c0_7 = arith.constant 0 : index
    %30 = vector.load %arg2[%29, %c0_7] : memref<16x32xf32, #tpu.memory_space<vmem>>, vector<8x32xf32>
    %31 = arith.index_cast %28 : i32 to index
    %c0_8 = arith.constant 0 : index
    %32 = vector.load %arg3[%31, %c0_8] : memref<16x1xi32, #tpu.memory_space<vmem>>, vector<8x1xi32>
    %c0_i32_9 = arith.constant 0 : i32
    %33 = vector.broadcast %c0_i32_9 : i32 to vector<8x1xi32>
    %34 = arith.cmpi ne, %32, %33 : vector<8x1xi32>
    %35 = arith.extui %34 : vector<8x1xi1> to vector<8x1xi32>
    %36 = arith.sitofp %35 : vector<8x1xi32> to vector<8x1xf32>
    %37 = vector.broadcast %3 : i32 to vector<8x1xi32>
    %38 = arith.subi %32, %37 : vector<8x1xi32>
    %39 = vector.broadcast %38 : vector<8x1xi32> to vector<8x32xi32>
    %40 = arith.cmpi eq, %4, %39 : vector<8x32xi32>
    %41 = vector.broadcast %cst_1 : f32 to vector<8x32xf32>
    %42 = vector.broadcast %cst_2 : f32 to vector<8x32xf32>
    %43 = arith.select %40, %41, %42 : vector<8x32xi1>, vector<8x32xf32>
    %44 = arith.mulf %43, %30 : vector<8x32xf32>
    %45 = vector.broadcast %36 : vector<8x1xf32> to vector<8x32xf32>
    %46 = arith.mulf %44, %45 : vector<8x32xf32>
    %47 = arith.subf %26, %46 : vector<8x32xf32>
    %c2_i32 = arith.constant 2 : i32
    %c0_10 = arith.constant 0 : index
    %c0_11 = arith.constant 0 : index
    %c0_12 = arith.constant 0 : index
    %48 = vector.load %arg4[%c0_10, %c0_11, %c0_12] : memref<1x8x32xf32, #tpu.memory_space<vmem>>, vector<1x8x32xf32>
    %49 = vector.shape_cast %47 : vector<8x32xf32> to vector<1x8x32xf32>
    %50 = arith.addf %48, %49 : vector<1x8x32xf32>
    %c0_13 = arith.constant 0 : index
    %c0_14 = arith.constant 0 : index
    %c0_15 = arith.constant 0 : index
    %51 = vector.load %arg4[%c0_13, %c0_14, %c0_15] : memref<1x8x32xf32, #tpu.memory_space<vmem>>, vector<1x8x32xf32>
    tpu.vector_store %arg4[%c0_13, %c0_14, %c0_15], %50 {strides = array<i32>} : memref<1x8x32xf32, #tpu.memory_space<vmem>>, vector<1x8x32xf32>,
    %c0_i32_16 = arith.constant 0 : i32
    %52 = arith.cmpi eq, %arg1, %c0_i32_16 : i32
    %53 = arith.extui %52 : i1 to i32
    %cst_17 = arith.constant 0.00333333341 : f32
    %c0_i32_18 = arith.constant 0 : i32
    %54 = arith.cmpi ne, %53, %c0_i32_18 : i32
    scf.if %54 {
      %c0_19 = arith.constant 0 : index
      %c0_20 = arith.constant 0 : index
      %55 = vector.load %arg2[%c0_19, %c0_20] : memref<16x32xf32, #tpu.memory_space<vmem>>, vector<16x1xf32>
      %c0_21 = arith.constant 0 : index
      %c0_22 = arith.constant 0 : index
      %56 = vector.load %arg3[%c0_21, %c0_22] : memref<16x1xi32, #tpu.memory_space<vmem>>, vector<16x1xi32>
      %c0_i32_23 = arith.constant 0 : i32
      %57 = vector.broadcast %c0_i32_23 : i32 to vector<16x1xi32>
      %58 = arith.cmpi ne, %56, %57 : vector<16x1xi32>
      %59 = arith.extui %58 : vector<16x1xi1> to vector<16x1xi32>
      %60 = arith.sitofp %59 : vector<16x1xi32> to vector<16x1xf32>
      %61 = vector.broadcast %cst_17 : f32 to vector<16x1xf32>
      %62 = arith.mulf %61, %55 : vector<16x1xf32>
      %63 = arith.mulf %62, %60 : vector<16x1xf32>
      %64 = vector.shape_cast %63 : vector<16x1xf32> to vector<1x16x1xf32>
      %cst_24 = arith.constant dense<0.000000e+00> : vector<1xf32>
      %65 = vector.multi_reduction <add>, %64, %cst_24 [1, 2] : vector<1x16x1xf32> to vector<1xf32>
      %66 = vector.shape_cast %65 : vector<1xf32> to vector<1x1x1xf32>
      %67 = vector.extract %66[0, 0, 0] : f32 from vector<1x1x1xf32>
      %68 = tpu.iota {dimensions = array<i32: 0>} : vector<8x32xi32>
      %69 = tpu.iota {dimensions = array<i32: 1>} : vector<8x32xi32>
      %c0_i32_25 = arith.constant 0 : i32
      %70 = vector.broadcast %c0_i32_25 : i32 to vector<8x32xi32>
      %71 = arith.cmpi eq, %68, %70 : vector<8x32xi32>
      %c0_i32_26 = arith.constant 0 : i32
      %72 = vector.broadcast %c0_i32_26 : i32 to vector<8x32xi32>
      %73 = arith.cmpi eq, %69, %72 : vector<8x32xi32>
      %74 = arith.andi %71, %73 : vector<8x32xi1>
      %cst_27 = arith.constant 0.000000e+00 : f32
      %75 = vector.broadcast %67 : f32 to vector<8x32xf32>
      %76 = vector.broadcast %cst_27 : f32 to vector<8x32xf32>
      %77 = arith.select %74, %75, %76 : vector<8x32xi1>, vector<8x32xf32>
      %c0_28 = arith.constant 0 : index
      %c0_29 = arith.constant 0 : index
      %c0_30 = arith.constant 0 : index
      %78 = vector.load %arg4[%c0_28, %c0_29, %c0_30] : memref<1x8x32xf32, #tpu.memory_space<vmem>>, vector<1x8x32xf32>
      %79 = vector.shape_cast %77 : vector<8x32xf32> to vector<1x8x32xf32>
      %80 = arith.addf %78, %79 : vector<1x8x32xf32>
      %c0_31 = arith.constant 0 : index
      %c0_32 = arith.constant 0 : index
      %c0_33 = arith.constant 0 : index
      %81 = vector.load %arg4[%c0_31, %c0_32, %c0_33] : memref<1x8x32xf32, #tpu.memory_space<vmem>>, vector<1x8x32xf32>
      tpu.vector_store %arg4[%c0_31, %c0_32, %c0_33], %80 {strides = array<i32>} : memref<1x8x32xf32, #tpu.memory_space<vmem>>, vector<1x8x32xf32>,
    } else {
    }
    return
  }
  func.func @transform_0(%arg0: i32, %arg1: i32) -> (i32, i32) {
    %c0_i32 = arith.constant 0 : i32
    return %arg0, %arg1 : i32, i32
  }
  func.func @transform_1(%arg0: i32, %arg1: i32) -> (i32, i32) {
    %c0_i32 = arith.constant 0 : i32
    %c0_i32_0 = arith.constant 0 : i32
    return %arg0, %c0_i32 : i32, i32
  }
  func.func @transform_2(%arg0: i32, %arg1: i32) -> (i32, i32, i32) {
    %c0_i32 = arith.constant 0 : i32
    %c0_i32_0 = arith.constant 0 : i32
    %c0_i32_1 = arith.constant 0 : i32
    return %arg0, %c0_i32, %c0_i32_0 : i32, i32, i32
  }
}

</mosaic_0001>

<bundles_post_ra>
// kernel: tpu_custom_call.1
= control target key start
LH: loop header
LB: loop body
LE: loop exit
PB: predicated region body
PF: predicated region fallthrough
CT: control target
= control target key end

     0   :  { %v156_v6 = vmov 0   ;;  %v157_v7 = vmov 0.0   ;;  %vm83_vm2 = vcmask 7168   ;;  %s193_s0 = inlined_call_operand.vmem [shape: f32[16,32], index: 0, kind: input, shape index: {}]   ;;  %s194_s1 = inlined_call_operand.vmem [shape: s32[16,1], index: 1, kind: input, shape index: {}]   ;;  %s195_s2 = inlined_call_operand.hbm [shape: f32[1,8,32], index: 2, kind: output, shape index: {}]  }
   0x1   :  { %v69_v0 = vld [vmem:[%s193_s0] sm:$0xff]  ;;  %v70_v1 = vld [vmem:[%s193_s0 + $0x8] sm:$0xff]  ;;  %133 = vset.pattern.permute.xlu1 %v156_v6  ;;  %132 = vset.pattern.permute.xlu0 %v156_v6 }
   0x2   :  { %v71_v2 = vld [vmem:[%s194_s1] sm:$0xff]  ;;  %v72_v3 = vld [vmem:[%s194_s1 + $0x8] sm:$0xff]  ;;  %v79_v4 = vmul.f32 0.0033333334, %v69_v0  ;;  %v80_v5 = vmul.f32 0.0033333334, %v70_v1 }
   0x3   :  { %vm73_vm0 = vcmp.ne.s32.totalorder %v71_v2, 0  ;;  %vm74_vm1 = vcmp.ne.s32.totalorder %v72_v3, 0  ;;  %50 = vperm.xlu1 %133, %v72_v3  }
   0x4   :  { %v124_v8 = vsel %vm73_vm0, 1.0, %v157_v7 }
   0x5   :  { %7 = vsyncpa [#allocation3], 0  ;;  %v125_v9 = vsel %vm74_vm1, 1.0, %v157_v7  ;;  %v81_v10 = vmul.f32 %v124_v8, %v79_v4  ;;  %vm16_vm3 = vcmask 261120   ;;  %v19_v15 = vlaneseq  ;;  %s159_s1 = smov [#allocation2]  }
   0x6   :  { %v82_v11 = vmul.f32 %v125_v9, %v80_v5  ;;  %17 = vst.msk [vmem:[#allocation2] sm:$0xff] %vm16_vm3, %v157_v7  ;;  %v158_v23 = vmov 0.0033333334   ;;  %s112_s17 = sshll.u32 %s159_s1, 4  ;;  %s113_s17 = int_to_ptr.vmem [resolvable:$true] %s112_s17 }
   0x7   :  { %v84_v12 = vsel %vm83_vm2, %v81_v10, 0.0  ;;  %36 = vperm.xlu1 %133, %v124_v8   ;;  %v20_v19 = vand.u32 127, %v19_v15  ;;  %v97_v39 = vshrl.u32 %v19_v15, 7  ;;  %s134_s18 = scalar_lea.vmem %s113_s17, 128  ;;  %p139_p1 = scmp.lt.s32.totalorder %s113_s17, %s113_s17 }
   0x8   :  { %v85_v13 = vsel %vm83_vm2, %v82_v11, 0.0  ;;  %p135_p0 = scmp.ne.s32.totalorder %s113_s17, %s134_s18  ;;  %p140_p2 = scmp.lt.s32.totalorder %s134_s18, %s134_s18 }
   0x9   :  { %v86_v14 = vadd.f32 %v85_v13, %v84_v12  ;;  %vm98_vm6 = vcmp.eq.s32.totalorder %v97_v39, 0  ;;  %vm99_vm7 = vcmp.eq.s32.totalorder %v20_v19, 0 }
   0xa   :  { %vm100_vm8 = vmand %vm98_vm6, %vm99_vm7  ;;  %p141_p3 = por %p140_p2, %p139_p1 }
   0xb   :  { %87 = vadd.xlane.f32.xlu0 %v86_v14  ;;  %57 = vperm.xlu1 %133, %v125_v9  }
   0xc   :  { %p142_p4 = pnand %p141_p3, %p135_p0 }
   0xd   :  { %v62_v36 = vld [vmem:[#allocation2] sm:$0xff] }
  0x21   :  { %29 = vperm.xlu0 %132, %v71_v2  }
  0x7e   :  { %v51_v16 = vpop.permute.xlu1 %50 }
  0x7f   :  { %vm52_vm4 = vcmp.eq.s32.totalorder %v20_v19, %v51_v16 }
  0x80   :  { %v53_v24 = vsel %vm52_vm4, 0.9, %v158_v23 }
  0x81   :  { %v54_v28 = vmul.f32 %v70_v1, %v53_v24 }
  0x82   :  { %v37_v21 = vpop.permute.xlu1 %36 }
  0x86   :  { %v58_v30 = vpop.permute.xlu1 %57 }
  0x87   :  { %v60_v34 = vmul.f32 %v58_v30, %v54_v28 }
  0x94   :  { %v88_v17 = vpop.xlane.xlu0 %87 }
  0x95   :  { %v89_v18 = vrot.slane %v88_v17, 4 }
  0x97   :  { %v90_v20 = vadd.f32 %v89_v18, %v88_v17 }
  0x99   :  { %v91_v22 = vrot.slane %v90_v20, 2 }
  0x9b   :  { %v92_v25 = vadd.f32 %v91_v22, %v90_v20 }
  0x9c   :  { %v30_v26 = vpop.permute.xlu0 %29 }
  0x9d   :  { %v93_v27 = vrot.slane %v92_v25, 1  ;;  %vm31_vm5 = vcmp.eq.s32.totalorder %v20_v19, %v30_v26 }
  0x9e   :  { %v32_v29 = vsel %vm31_vm5, 0.9, %v158_v23 }
  0x9f   :  { %v94_v31 = vadd.f32 %v93_v27, %v92_v25  ;;  %v33_v32 = vmul.f32 %v69_v0, %v32_v29 }
  0xa1   :  { %126 = vpush %v94_v31  ;;  %v39_v33 = vmul.f32 %v37_v21, %v33_v32 }
  0xa3   :  { %v40_v35 = vsub.f32 0.0, %v39_v33 }
  0xa5   :  { %v61_v37 = vsub.f32 %v40_v35, %v60_v34 }
  0xa7   :  { %v63_v38 = vadd.f32 %v62_v36, %v61_v37 }
  0xa9   :  { %65 = vst.msk [vmem:[#allocation2] sm:$0xff] %vm16_vm3, %v63_v38 }
  0xb0   :  { %v103_v42 = vld [vmem:[#allocation2] sm:$0xff] }
  0xd2   :  { %s127_s0 = spop %126 }
  0xd3   :  { %v101_v40 = vstv %s127_s0 }
  0xd4   :  { %v102_v41 = vsel %vm100_vm8, %v101_v40, 0.0 }
  0xd5   :  { %v104_v43 = vadd.f32 %v103_v42, %v102_v41 }
  0xd7   :  { %105 = vst.msk [vmem:[#allocation2] sm:$0xff] %vm16_vm3, %v104_v43 }
  0xd8   :  { %145 = shalt.err (!%p142_p4)
}
  0xd9   :  { %115 = dma.vmem_to_hbm [thread:$0]  %s113_s17, 128, %s195_s2, [#allocation3]  }
  0xda   :  { %154 = dma.done.wait [#allocation3], 128  }
  0xdb   :  { %155 = vsyncadd [#allocation3], 4294967168 }
  0xdc   :  { %119 = vsyncpa [#allocation3], 1 }

</bundles_post_ra>
